<compile_context>
chip_gen: v7x
topology: tpu7x:2x2x1
jax: 0.10.0
libtpu: 0.0.40
codegen_flags: <defaults>
</compile_context>

<pallas_src>
import functools

import jax
import jax.numpy as jnp
from jax import lax
from jax.experimental import pallas as pl
from jax.experimental.pallas import tpu as pltpu

Z_DIM = 64
HIDDEN = 256


def _round_up(n, m):
    return (n + m - 1) // m * m


def _batch_tiling(B):
    """Pick (padded batch, batch tile).  Tile is a multiple of 8 rows.
    Small/medium batches: 2 grid steps (both v7x TensorCores get work).
    Large batches: 512-row tiles to amortize per-grid-step overhead."""
    Bp16 = _round_up(max(B, 16), 16)
    if Bp16 <= 1024:
        tile = Bp16 // 2          # multiple of 8, exactly 2 grid steps
        return Bp16, tile
    tile = 512
    return _round_up(B, tile), tile


def _generator_kernel(x_ref, w1_ref, b1_ref, w2_ref, b2_ref, out_ref):
    # x: (TILE_B, Zp) bf16, w1: (Zp, HIDDEN) bf16 -> f32 accumulate on MXU.
    h = jnp.dot(x_ref[...], w1_ref[...], preferred_element_type=jnp.float32)
    h = h + b1_ref[...]                           # (1, HIDDEN) f32 bias broadcasts
    h = jnp.maximum(h, jnp.float32(0.01) * h)     # LeakyReLU(0.01) on VPU (f32)
    # Second matmul: bf16 operands, f32 accumulate.
    o = jnp.dot(h.astype(jnp.bfloat16), w2_ref[...],
                preferred_element_type=jnp.float32)  # (TILE_B, IMGp) f32
    o = o + b2_ref[...]
    out_ref[...] = jnp.tanh(o).astype(out_ref.dtype)  # Tanh (EUP), bf16 store


def prepare_params(w1, b1, w2, b2):
    """One-time padding + bf16 cast of the weights (hoisted out of the forward).
    Weights are stored (in, out): y = x @ W + b."""
    Z, H = w1.shape
    img_dim = w2.shape[1]
    Zp = _round_up(Z, 128)          # 64 -> 128: full-depth MXU pass, lane-dense x
    IMGp = _round_up(img_dim, 128)  # 784 -> 896: unmasked lane-dense stores
    bf16, f32 = jnp.bfloat16, jnp.float32
    w1p = jnp.zeros((Zp, H), bf16).at[:Z, :].set(w1.astype(bf16))
    b1p = b1.reshape(1, H).astype(f32)
    w2p = jnp.zeros((H, IMGp), bf16).at[:, :img_dim].set(w2.astype(bf16))
    b2p = jnp.zeros((1, IMGp), f32).at[:, :img_dim].set(
        b2.reshape(1, img_dim).astype(f32))
    return w1p, b1p, w2p, b2p


@jax.jit
def generator_forward_padded(x, w1p, b1p, w2p, b2p):
    """x: (B, Z_DIM) any float dtype; pre-padded params from prepare_params.
    Returns the padded (Bp, IMGp) bf16 output; valid data in [:B, :img_dim]."""
    B, Z = x.shape
    Zp, H = w1p.shape
    IMGp = w2p.shape[1]
    Bp, tile_b = _batch_tiling(B)

    # Only per-call prep: pad+cast the (small) latent batch.
    xp = jnp.zeros((Bp, Zp), jnp.bfloat16).at[:B, :Z].set(x.astype(jnp.bfloat16))

    out = pl.pallas_call(
        _generator_kernel,
        out_shape=jax.ShapeDtypeStruct((Bp, IMGp), jnp.bfloat16),
        grid=(Bp // tile_b,),
        in_specs=[
            pl.BlockSpec((tile_b, Zp), lambda i: (i, 0)),  # x: streamed per batch tile
            pl.BlockSpec((Zp, H), lambda i: (0, 0)),       # w1: VMEM-resident
            pl.BlockSpec((1, H), lambda i: (0, 0)),        # b1: resident
            pl.BlockSpec((H, IMGp), lambda i: (0, 0)),     # w2: resident
            pl.BlockSpec((1, IMGp), lambda i: (0, 0)),     # b2: resident
        ],
        out_specs=pl.BlockSpec((tile_b, IMGp), lambda i: (i, 0)),
        compiler_params=pltpu.CompilerParams(
            dimension_semantics=("parallel",),  # batch tiles independent (v7x megacore)
        ),
    )(xp, w1p, b1p, w2p, b2p)
    return out


def generator_forward(x, w1p, b1p, w2p, b2p, img_dim):
    """Convenience wrapper that strips padding (only for verification/consumers
    that need the exact (B, img_dim) view)."""
    B = x.shape[0]
    return generator_forward_padded(x, w1p, b1p, w2p, b2p)[:B, :img_dim]


def init_params(key, img_dim):
    """Deterministic init mimicking torch.nn.Linear defaults:
       U(-1/sqrt(fan_in), 1/sqrt(fan_in)) for both weight and bias."""
    k1, k2, k3, k4 = jax.random.split(key, 4)
    lim1 = 1.0 / (Z_DIM ** 0.5)
    lim2 = 1.0 / (HIDDEN ** 0.5)
    w1 = jax.random.uniform(k1, (Z_DIM, HIDDEN), jnp.float32, -lim1, lim1)
    b1 = jax.random.uniform(k2, (HIDDEN,), jnp.float32, -lim1, lim1)
    w2 = jax.random.uniform(k3, (HIDDEN, img_dim), jnp.float32, -lim2, lim2)
    b2 = jax.random.uniform(k4, (img_dim,), jnp.float32, -lim2, lim2)
    return w1, b1, w2, b2


def reference_forward(x, w1, b1, w2, b2):
    h = jnp.dot(x, w1, precision=lax.Precision.HIGHEST) + b1
    h = jnp.maximum(h, 0.01 * h)
    return jnp.tanh(jnp.dot(h, w2, precision=lax.Precision.HIGHEST) + b2)


if __name__ == "__main__":
    IMG_DIM = 784   # 28*28 MNIST (simpleGANs); lanes padded to 896 inside
    BATCH = 32      # small GAN batch -> exercises the 2-tile small-batch path

    key = jax.random.PRNGKey(0)
    k_x, k_p = jax.random.split(key)
    x = jax.random.normal(k_x, (BATCH, Z_DIM), jnp.float32)
    w1, b1, w2, b2 = init_params(k_p, IMG_DIM)

    # One-time parameter preparation (padding + bf16 cast), outside the hot path.
    w1p, b1p, w2p, b2p = prepare_params(w1, b1, w2, b2)
    w1p, b1p, w2p, b2p = jax.block_until_ready((w1p, b1p, w2p, b2p))

    # Hot path: padded bf16 output, no post-kernel slice.
    out_padded = generator_forward_padded(x, w1p, b1p, w2p, b2p)
    out_padded = jax.block_until_ready(out_padded)

    Bp, _ = _batch_tiling(BATCH)
    assert out_padded.shape == (Bp, _round_up(IMG_DIM, 128))
    assert out_padded.dtype == jnp.bfloat16

    # Verification only: strip padding and compare against the f32 reference.
    out = out_padded[:BATCH, :IMG_DIM].astype(jnp.float32)
    ref = reference_forward(x, w1, b1, w2, b2)
    assert out.shape == (BATCH, IMG_DIM)
    assert bool(jnp.all(jnp.isfinite(out)))
    assert jnp.allclose(out, ref, atol=1e-1), "kernel mismatch vs reference"

    print("KERNEL_OK")
</pallas_src>

<mosaic_0001>
module attributes {stable_mosaic.version = 11 : i64} {
  func.func @_generator_kernel(%arg0: i32, %arg1: memref<16x128xbf16, #tpu.memory_space<vmem>>, %arg2: memref<128x256xbf16, #tpu.memory_space<vmem>>, %arg3: memref<1x256xf32, #tpu.memory_space<vmem>>, %arg4: memref<256x896xbf16, #tpu.memory_space<vmem>>, %arg5: memref<1x896xf32, #tpu.memory_space<vmem>>, %arg6: memref<16x896xbf16, #tpu.memory_space<vmem>>) attributes {dimension_semantics = [#tpu.dimension_semantics<parallel>], iteration_bounds = array<i64: 2>, scalar_prefetch = 0 : i64, scratch_operands = 0 : i64, tpu.core_type = #tpu.core_type<tc>, window_params = [{transform_indices = @transform_0, window_bounds = array<i64: 16, 128>}, {pipeline_mode = #tpu.pipeline_mode<synchronous>, transform_indices = @transform_1, window_bounds = array<i64: 128, 256>}, {pipeline_mode = #tpu.pipeline_mode<synchronous>, transform_indices = @transform_2, window_bounds = array<i64: 1, 256>}, {pipeline_mode = #tpu.pipeline_mode<synchronous>, transform_indices = @transform_3, window_bounds = array<i64: 256, 896>}, {pipeline_mode = #tpu.pipeline_mode<synchronous>, transform_indices = @transform_4, window_bounds = array<i64: 1, 896>}, {transform_indices = @transform_5, window_bounds = array<i64: 16, 896>}]} {
    %c0 = arith.constant 0 : index
    %c0_0 = arith.constant 0 : index
    %0 = vector.load %arg1[%c0, %c0_0] : memref<16x128xbf16, #tpu.memory_space<vmem>>, vector<16x128xbf16>
    %c0_1 = arith.constant 0 : index
    %c0_2 = arith.constant 0 : index
    %1 = vector.load %arg2[%c0_1, %c0_2] : memref<128x256xbf16, #tpu.memory_space<vmem>>, vector<128x256xbf16>
    %cst = arith.constant dense<0.000000e+00> : vector<16x256xf32>
    %2 = tpu.matmul %0, %1, %cst {dimension_numbers = #tpu.dot_dimension_numbers<[1], [0], [0], [1], [0, 0, 1, 1], [], []>} : vector<16x128xbf16>, vector<128x256xbf16>, vector<16x256xf32> -> vector<16x256xf32>
    %c0_3 = arith.constant 0 : index
    %c0_4 = arith.constant 0 : index
    %3 = vector.load %arg3[%c0_3, %c0_4] : memref<1x256xf32, #tpu.memory_space<vmem>>, vector<1x256xf32>
    %4 = vector.broadcast %3 : vector<1x256xf32> to vector<16x256xf32>
    %5 = arith.addf %2, %4 : vector<16x256xf32>
    %cst_5 = arith.constant 0.00999999977 : f32
    %6 = vector.broadcast %cst_5 : f32 to vector<16x256xf32>
    %7 = arith.mulf %6, %5 : vector<16x256xf32>
    %8 = arith.maximumf %5, %7 : vector<16x256xf32>
    %9 = arith.truncf %8 : vector<16x256xf32> to vector<16x256xbf16>
    %c0_6 = arith.constant 0 : index
    %c0_7 = arith.constant 0 : index
    %10 = vector.load %arg4[%c0_6, %c0_7] : memref<256x896xbf16, #tpu.memory_space<vmem>>, vector<256x896xbf16>
    %cst_8 = arith.constant dense<0.000000e+00> : vector<16x896xf32>
    %11 = tpu.matmul %9, %10, %cst_8 {dimension_numbers = #tpu.dot_dimension_numbers<[1], [0], [0], [1], [0, 0, 1, 1], [], []>} : vector<16x256xbf16>, vector<256x896xbf16>, vector<16x896xf32> -> vector<16x896xf32>
    %c0_9 = arith.constant 0 : index
    %c0_10 = arith.constant 0 : index
    %12 = vector.load %arg5[%c0_9, %c0_10] : memref<1x896xf32, #tpu.memory_space<vmem>>, vector<1x896xf32>
    %13 = vector.broadcast %12 : vector<1x896xf32> to vector<16x896xf32>
    %14 = arith.addf %11, %13 : vector<16x896xf32>
    %15 = math.tanh %14 : vector<16x896xf32>
    %16 = arith.truncf %15 : vector<16x896xf32> to vector<16x896xbf16>
    %c0_11 = arith.constant 0 : index
    %c0_12 = arith.constant 0 : index
    %17 = vector.load %arg6[%c0_11, %c0_12] : memref<16x896xbf16, #tpu.memory_space<vmem>>, vector<16x896xbf16>
    tpu.vector_store %arg6[%c0_11, %c0_12], %16 {strides = array<i32>} : memref<16x896xbf16, #tpu.memory_space<vmem>>, vector<16x896xbf16>,
    return
  }
  func.func @transform_0(%arg0: i32) -> (i32, i32) {
    %c0_i32 = arith.constant 0 : i32
    %c0_i32_0 = arith.constant 0 : i32
    return %arg0, %c0_i32 : i32, i32
  }
  func.func @transform_1(%arg0: i32) -> (i32, i32) {
    %c0_i32 = arith.constant 0 : i32
    %c0_i32_0 = arith.constant 0 : i32
    %c0_i32_1 = arith.constant 0 : i32
    return %c0_i32, %c0_i32_0 : i32, i32
  }
  func.func @transform_2(%arg0: i32) -> (i32, i32) {
    %c0_i32 = arith.constant 0 : i32
    %c0_i32_0 = arith.constant 0 : i32
    %c0_i32_1 = arith.constant 0 : i32
    return %c0_i32, %c0_i32_0 : i32, i32
  }
  func.func @transform_3(%arg0: i32) -> (i32, i32) {
    %c0_i32 = arith.constant 0 : i32
    %c0_i32_0 = arith.constant 0 : i32
    %c0_i32_1 = arith.constant 0 : i32
    return %c0_i32, %c0_i32_0 : i32, i32
  }
  func.func @transform_4(%arg0: i32) -> (i32, i32) {
    %c0_i32 = arith.constant 0 : i32
    %c0_i32_0 = arith.constant 0 : i32
    %c0_i32_1 = arith.constant 0 : i32
    return %c0_i32, %c0_i32_0 : i32, i32
  }
  func.func @transform_5(%arg0: i32) -> (i32, i32) {
    %c0_i32 = arith.constant 0 : i32
    %c0_i32_0 = arith.constant 0 : i32
    return %arg0, %c0_i32 : i32, i32
  }
}

</mosaic_0001>

<bundles_post_ra>
// kernel: generator_forward_padded.1
= control target key start
LH: loop header
LB: loop body
LE: loop exit
PB: predicated region body
PF: predicated region fallthrough
CT: control target
= control target key end

     0   :  { %10 = vsyncpa [#allocation3], 0  ;;  %s2364_s0 = inlined_call_operand.vmem [shape: bf16[32,128], index: 0, kind: input, shape index: {}]   ;;  %s2365_s1 = inlined_call_operand.hbm [shape: bf16[128,256], index: 1, kind: input, shape index: {}]   ;;  %s2366_s2 = inlined_call_operand.vmem [shape: f32[1,256], index: 2, kind: input, shape index: {}]   ;;  %s2367_s3 = inlined_call_operand.hbm [shape: bf16[256,896], index: 3, kind: input, shape index: {}]   ;;  %s2368_s4 = inlined_call_operand.vmem [shape: f32[1,896], index: 4, kind: input, shape index: {}]   ;;  %s2369_s5 = inlined_call_operand.hbm [shape: bf16[32,896], index: 5, kind: output, shape index: {}]  }
   0x1   :  { %11 = vsyncpa [#allocation6], 0 }
   0x2   :  { %12 = vsyncpa [#allocation4], 0 }
   0x3   :  { %14 = vsyncpa [#allocation4 + $0x1], 0  ;;  %s2134_s18 = smov 0   ;;  %s2136_s19 = smov 0  }
   0x4   :  { %s2138_s20 = smov 0   ;;  %s2140_s21 = smov 0  }
   0x5 LB: > { %s2155_s22 = sadd.s32 4294967295, %s2092_s21   ;;  %s1502_s23 = sadd.s32 4294967294, %s2092_s21   ;;  %s2092_s21 = sphi %s2140_s21, %s2387_s21   ;;  %s2088_s20 = sphi %s2138_s20, %s2386_s20   ;;  %s2084_s19 = sphi %s2136_s19, %s2385_s19   ;;  %s2080_s18 = sphi %s2134_s18, %s2384_s18  }
   0x6   : > { %s2159_s24 = sadd.s32 1, %s2092_s21   ;;  %s137_s25 = sadd.s32 1, %s2088_s20 }
   0x7   : > { %s134_s26 = ssub.s32 %s2092_s21, %s2159_s24  ;;  %p147_p0 = scmp.ne.s32.totalorder %s2088_s20, %s2084_s19 }
   0x8   : > { %p135_p1 = scmp.eq.s32.totalorder %s134_s26, 0  ;;  %p148_p2 = scmp.eq.s32.totalorder %s2155_s22, 1 }
   0x9   : > { %p153_p3 = scmp.ne.s32.totalorder %s2084_s19, %s2080_s18  ;;  %p154_p4 = scmp.eq.s32.totalorder %s1502_s23, 1 }
   0xa   : > { %s2170_s27 = scalar_select %p135_p1, %s2088_s20, %s137_s25  }
   0xb   : > { %p2172_p5 = por %p148_p2, %p147_p0  ;;  %p2176_p6 = por %p154_p4, %p153_p3 }
   0xc   : > { %p1503_p7 = scmp.ge.s32.totalorder %s2092_s21, 1  ;;  %p161_p8 = scmp.lt.s32.totalorder %s2092_s21, 3 }
   0xd   : > { %s2373_s28 = scalar_select %p2172_p5, 1, 0 }
   0xe   : > { %s2374_s29 = scalar_select %p2176_p6, 1, 0 }
   0xf   : > { %p2370_p9 = scmp.eq.s32.totalorder %s2155_s22, 0  ;;  %p2183_p10 = pnand %p1503_p7, %p161_p8 }
  0x10   : > { %s2094_s6 = smov [#allocation2]   ;;  %s2095_s9 = smov [#allocation5]  }
  0x11   : > { %s2375_s30 = scalar_select %p2183_p10, 1, 0 }
  0x12   : > { %s173_s7 = sshll.u32 %s2094_s6, 4  ;;  %p1696_p11 = pneg %p2183_p10  ;;  %s174_s7 = int_to_ptr.vmem [resolvable:$true] %s173_s7 }
  0x13   : > { %s189_s10 = sshll.u32 %s2095_s9, 4  ;;  %s1966_s13 = scalar_lea.hbm %s2365_s1, 2048  ;;  %s2195_s10 = int_to_ptr.vmem [resolvable:$true] %s189_s10 }
  0x14   : > { %p2191_p12 = pnand %p2370_p9, %p1696_p11  ;;  %p1967_p13 = scmp.ne.s32.totalorder %s2365_s1, %s1966_s13 }
  0x15   : > { %p1973_p3 = scmp.lt.u32.totalorder %s1966_s13, %s2365_s1 }
  0x16   : > { %p1968_p0 = pneg %p2191_p12 }
  0x18   : > { %p1969_p1 = pnand %p1968_p0, %p1967_p13 }
  0x1a   : > { %p1970_p2 = pneg %p1969_p1 }
  0x1c   : > { %p1975_p4 = pnand %p1973_p3, %p1970_p2 }
  0x1e   : > { %1978 = shalt.err (!%p1975_p4)
}
  0x1f   : > { %s1979_s23 = scalar_lea.vmem %s174_s7, 2048  ;;  %p1987_p9 = scmp.lt.s32.totalorder %s174_s7, %s174_s7 }
  0x20   : > { %p1980_p7 = scmp.ne.s32.totalorder %s174_s7, %s1979_s23  ;;  %p1988_p6 = scmp.lt.s32.totalorder %s1979_s23, %s1979_s23 }
  0x22   : > { %p1982_p8 = pnand %p1980_p7, %p1968_p0  ;;  %p1989_p5 = por %p1988_p6, %p1987_p9 }
  0x24   : > { %p1983_p11 = pneg %p1982_p8 }
  0x26   : > { %p1990_p10 = pnand %p1989_p5, %p1983_p11 }
  0x28   : > { %1993 = shalt.err (!%p1990_p10)
}
  0x29   : > { %s2096_s25 = smov 128   ;;  %s2097_s26 = smov 8  }
  0x2a   : > { %1699 = dma.hbm_to_vmem [thread:$0]  (!%p2191_p12), %s2365_s1, 2048, %s174_s7, [#allocation3], %s2096_s25, %s2096_s25, %s2097_s26  }
  0x2b   : > { %s1994_s13 = scalar_lea.hbm %s2367_s3, 14336 }
  0x2c   : > { %p1995_p13 = scmp.ne.s32.totalorder %s2367_s3, %s1994_s13  ;;  %p2001_p9 = scmp.lt.u32.totalorder %s1994_s13, %s2367_s3 }
  0x2e   : > { %p1997_p5 = pnand %p1995_p13, %p1968_p0 }
  0x30   : > { %p1998_p6 = pneg %p1997_p5 }
  0x32   : > { %p2003_p10 = pnand %p2001_p9, %p1998_p6 }
  0x34   : > { %2006 = shalt.err (!%p2003_p10)
}
  0x35   : > { %s2007_s7 = scalar_lea.vmem %s2195_s10, 14336  ;;  %p2015_p4 = scmp.lt.s32.totalorder %s2195_s10, %s2195_s10 }
  0x36   : > { %p2008_p1 = scmp.ne.s32.totalorder %s2195_s10, %s2007_s7  ;;  %p2016_p7 = scmp.lt.s32.totalorder %s2007_s7, %s2007_s7 }
  0x38   : > { %p2010_p2 = pnand %p2008_p1, %p1968_p0  ;;  %p2017_p8 = por %p2016_p7, %p2015_p4 }
  0x3a   : > { %p2011_p3 = pneg %p2010_p2 }
  0x3c   : > { %p2018_p11 = pnand %p2017_p8, %p2011_p3 }
  0x3e   : > { %2021 = shalt.err (!%p2018_p11)
}
  0x3f   : > { %s2098_s23 = smov 448   ;;  %s2099_s25 = smov 28  }
  0x40   : > { %1702 = dma.hbm_to_vmem [thread:$0]  (!%p2191_p12), %s2367_s3, 14336, %s2195_s10, [#allocation6], %s2098_s23, %s2098_s23, %s2099_s25  }
  0x41   : > { %p2377_p13 = scmp.ne.s32.totalorder %s2375_s30, 0 }
  0x42   : > { %p2378_p0 = scmp.eq.s32.totalorder (!%p2377_p13), %s2155_s22, 0 }
  0x43   : > { %217 = sbr.rel (%p2377_p13) target bundleno = 644 (0x284), region = 40 }
  0x4a   : > { %2067 = dma.done.wait (%p2378_p0), [#allocation3], 2048   ;;  %p2379_p5 = pmov %p2378_p0 }
  0x4b   : > { %p2380_p6 = pmov %p2378_p0 }
  0x4c   : > { %2069 = vsyncadd (%p2379_p5), [#allocation3], 4294965248 }
  0x4d   : > { %2071 = dma.done.wait (%p2380_p6), [#allocation6], 14336   ;;  %p2381_p9 = pmov %p2378_p0 }
  0x4e   : > { %v2100_v0 = vmov 0   ;;  %s1510_s8 = sshll.u32 %s2155_s22, 1  ;;  %v1753_v1 = vld [vmem:[#allocation2 + $0x4] ss:$8 sps:$4 sm:$0xff]   ;;  %v1755_v2 = vld [vmem:[#allocation2] ss:$8 sps:$4 sm:$0xff]  }
  0x4f   : > { %2073 = vsyncadd (%p2381_p9), [#allocation6], 4294952960  ;;  %405 = vmatprep.mubr.bf16.mxu0 %v2100_v0  ;;  %p250_p12 = scmp.lt.s32.totalorder %s1510_s8, 3  ;;  %373 = vmatprep.subr.bf16.mxu0 %v1753_v1  ;;  %v1756_v3 = vld [vmem:[#allocation2 + $0x14] ss:$8 sps:$4 sm:$0xff]   ;;  %s246_s16 = sand.u32 1, %s2084_s19  }
  0x50   : > { %374 = vmatpush1.bf16.msra.mxu0 %v1755_v2  ;;  %v1758_v4 = vld [vmem:[#allocation2 + $0x10] ss:$8 sps:$4 sm:$0xff]   ;;  %v1759_v5 = vld [vmem:[#allocation2 + $0x24] ss:$8 sps:$4 sm:$0xff]   ;;  %v1761_v6 = vld [vmem:[#allocation2 + $0x20] ss:$8 sps:$4 sm:$0xff]  }
  0x51   : > { %s2389_s8 = smov (!%p250_p12, %s1510_s8), 3  ;;  %375 = vmatprep.subr.bf16.mxu0 %v1756_v3  ;;  %v1762_v7 = vld [vmem:[#allocation2 + $0x34] ss:$8 sps:$4 sm:$0xff]   ;;  %v1764_v8 = vld [vmem:[#allocation2 + $0x30] ss:$8 sps:$4 sm:$0xff]   ;;  %s1684_s17 = smul.u32 56, %s246_s16 }
  0x52   : > { %s1511_s30 = sshll.u32 %s2389_s8, 2  ;;  %v1765_v9 = vld [vmem:[#allocation2 + $0x44] ss:$8 sps:$4 sm:$0xff]   ;;  %v1767_v11 = vld [vmem:[#allocation2 + $0x40] ss:$8 sps:$4 sm:$0xff]   ;;  %s1685_s23 = smul.u32 896, %s2155_s22 }
  0x53   : > { %s2258_s11 = scalar_lea.vmem %s2364_s0, %s1511_s30  ;;  %v1778_v10 = vld [vmem:[#allocation5 + $0x4] ss:$28 sps:$4 sm:$0xff]   ;;  %v1784_v13 = vld [vmem:[#allocation5 + $0x3c] ss:$28 sps:$4 sm:$0xff]   ;;  %v1790_v16 = vld [vmem:[#allocation5 + $0x74] ss:$28 sps:$4 sm:$0xff]  }
  0x54   : > { %376 = vmatpush1.bf16.msra.mxu0 %v1758_v4  ;;  %1167 = vmatprep.subr.bf16.mxu1 %v1778_v10  ;;  %v1783_v12 = vld [vmem:[#allocation5] ss:$28 sps:$4 sm:$0xff]   ;;  %v1789_v15 = vld [vmem:[#allocation5 + $0x38] ss:$28 sps:$4 sm:$0xff]   ;;  %v1771_v18 = vld [vmem:[#allocation2 + $0x64] ss:$8 sps:$4 sm:$0xff]   ;;  %s2318_s8 = scalar_lea.hbm %s2369_s5, %s1685_s23 }
  0x55   : > { %377 = vmatprep.subr.bf16.mxu0 %v1759_v5  ;;  %v1768_v14 = vld [vmem:[#allocation2 + $0x54] ss:$8 sps:$4 sm:$0xff]   ;;  %1168 = vmatpush1.bf16.msra.mxu1 %v1783_v12  ;;  %v1770_v17 = vld [vmem:[#allocation2 + $0x50] ss:$8 sps:$4 sm:$0xff]   ;;  %v1796_v20 = vld [vmem:[#allocation5 + $0xac] ss:$28 sps:$4 sm:$0xff]  }
  0x56   : > { %1169 = vmatprep.subr.bf16.mxu1 %v1784_v13  ;;  %v1795_v19 = vld [vmem:[#allocation5 + $0x70] ss:$28 sps:$4 sm:$0xff]   ;;  %v1773_v21 = vld [vmem:[#allocation2 + $0x60] ss:$8 sps:$4 sm:$0xff]   ;;  %v1774_v22 = vld [vmem:[#allocation2 + $0x74] ss:$8 sps:$4 sm:$0xff]  }
  0x57   : > { %v1801_v23 = vld [vmem:[#allocation5 + $0xa8] ss:$28 sps:$4 sm:$0xff]   ;;  %v1776_v25 = vld [vmem:[#allocation2 + $0x70] ss:$8 sps:$4 sm:$0xff]   ;;  %v1807_v27 = vld [vmem:[#allocation5 + $0xe0] ss:$28 sps:$4 sm:$0xff]  }
  0x58   : > { %378 = vmatpush1.bf16.msra.mxu0 %v1761_v6  ;;  %v1802_v24 = vld [vmem:[#allocation5 + $0xe4] ss:$28 sps:$4 sm:$0xff]   ;;  %v1782_v26 = vld [vmem:[#allocation5 + $0xc] ss:$28 sps:$4 sm:$0xff]   ;;  %v1808_v28 = vld [vmem:[#allocation5 + $0x11c] ss:$28 sps:$4 sm:$0xff]  }
  0x59   : > { %379 = vmatprep.subr.bf16.mxu0 %v1762_v7  ;;  %1170 = vmatpush1.bf16.msra.mxu1 %v1789_v15  ;;  %v1777_v29 = vld [vmem:[%s2258_s11] sm:$0xff]   ;;  %v1813_v32 = vld [vmem:[#allocation5 + $0x118] ss:$28 sps:$4 sm:$0xff]   ;;  %v1819_v36 = vld [vmem:[#allocation5 + $0x150] ss:$28 sps:$4 sm:$0xff]   ;;  %s2296_s7 = scalar_lea.vmem [#allocation7], %s1684_s17 }
  0x5a   : > { %1171 = vmatprep.subr.bf16.mxu1 %v1790_v16  ;;  %v1780_v30 = vld [vmem:[#allocation5 + $0x8] ss:$28 sps:$4 sm:$0xff]   ;;  %v1814_v33 = vld [vmem:[#allocation5 + $0x154] ss:$28 sps:$4 sm:$0xff]   ;;  %v1786_v34 = vld [vmem:[#allocation5 + $0x40] ss:$28 sps:$4 sm:$0xff]  }
  0x5b   : > { %v1788_v31 = vld [vmem:[#allocation5 + $0x44] ss:$28 sps:$4 sm:$0xff]   ;;  %v1794_v35 = vld [vmem:[#allocation5 + $0x7c] ss:$28 sps:$4 sm:$0xff]   ;;  %v1820_v37 = vld [vmem:[#allocation5 + $0x18c] ss:$28 sps:$4 sm:$0xff]  }
  0x5c   : > { %380 = vmatpush1.bf16.msra.mxu0 %v1764_v8  ;;  %v1792_v38 = vld [vmem:[#allocation5 + $0x78] ss:$28 sps:$4 sm:$0xff]   ;;  %v1825_v40 = vld [vmem:[#allocation5 + $0x188] ss:$28 sps:$4 sm:$0xff]   ;;  %v1798_v42 = vld [vmem:[#allocation5 + $0xb0] ss:$28 sps:$4 sm:$0xff]  }
  0x5d   : > { %381 = vmatprep.subr.bf16.mxu0 %v1765_v9  ;;  %1172 = vmatpush1.bf16.msra.mxu1 %v1795_v19  ;;  %v1800_v39 = vld [vmem:[#allocation5 + $0xb4] ss:$28 sps:$4 sm:$0xff]   ;;  %v1826_v41 = vld [vmem:[#allocation5 + $0x1c4] ss:$28 sps:$4 sm:$0xff]   ;;  %v1806_v43 = vld [vmem:[#allocation5 + $0xec] ss:$28 sps:$4 sm:$0xff]  }
  0x5e   : > { %1173 = vmatprep.subr.bf16.mxu1 %v1796_v20  ;;  %v1831_v44 = vld [vmem:[#allocation5 + $0x1c0] ss:$28 sps:$4 sm:$0xff]   ;;  %v1804_v45 = vld [vmem:[#allocation5 + $0xe8] ss:$28 sps:$4 sm:$0xff]   ;;  %v1837_v48 = vld [vmem:[#allocation5 + $0x1f8] ss:$28 sps:$4 sm:$0xff]   ;;  %v277_v20 = vlaneseq }
  0x5f   : > { %v1832_v46 = vld [vmem:[#allocation5 + $0x1fc] ss:$28 sps:$4 sm:$0xff]   ;;  %v1812_v47 = vld [vmem:[#allocation5 + $0x124] ss:$28 sps:$4 sm:$0xff]   ;;  %v1838_v49 = vld [vmem:[#allocation5 + $0x234] ss:$28 sps:$4 sm:$0xff]  }
  0x60   : > { %382 = vmatpush1.bf16.msra.mxu0 %v1767_v11  ;;  %v1810_v50 = vld [vmem:[#allocation5 + $0x120] ss:$28 sps:$4 sm:$0xff]   ;;  %v1843_v52 = vld [vmem:[#allocation5 + $0x230] ss:$28 sps:$4 sm:$0xff]   ;;  %v1816_v54 = vld [vmem:[#allocation5 + $0x158] ss:$28 sps:$4 sm:$0xff]  }
  0x61   : > { %383 = vmatprep.subr.bf16.mxu0 %v1768_v14  ;;  %1174 = vmatpush1.bf16.msra.mxu1 %v1801_v23  ;;  %v1818_v51 = vld [vmem:[#allocation5 + $0x15c] ss:$28 sps:$4 sm:$0xff]   ;;  %v1844_v53 = vld [vmem:[#allocation5 + $0x26c] ss:$28 sps:$4 sm:$0xff]   ;;  %v1824_v55 = vld [vmem:[#allocation5 + $0x194] ss:$28 sps:$4 sm:$0xff]  }
  0x62   : > { %1175 = vmatprep.subr.bf16.mxu1 %v1802_v24  ;;  %v1849_v56 = vld [vmem:[#allocation5 + $0x268] ss:$28 sps:$4 sm:$0xff]   ;;  %v1822_v58 = vld [vmem:[#allocation5 + $0x190] ss:$28 sps:$4 sm:$0xff]   ;;  %v1855_v60 = vld [vmem:[#allocation5 + $0x2a0] ss:$28 sps:$4 sm:$0xff]  }
  0x63   : > { %v1850_v57 = vld [vmem:[#allocation5 + $0x2a4] ss:$28 sps:$4 sm:$0xff]   ;;  %v1830_v59 = vld [vmem:[#allocation5 + $0x1cc] ss:$28 sps:$4 sm:$0xff]   ;;  %v1842_v0 = vld [vmem:[#allocation5 + $0x23c] ss:$28 sps:$4 sm:$0xff]  }
  0x64   : > { %384 = vmatpush1.bf16.msra.mxu0 %v1770_v17  ;;  %v1828_v61 = vld [vmem:[#allocation5 + $0x1c8] ss:$28 sps:$4 sm:$0xff]   ;;  %v1834_v63 = vld [vmem:[#allocation5 + $0x200] ss:$28 sps:$4 sm:$0xff]   ;;  %v1840_v1 = vld [vmem:[#allocation5 + $0x238] ss:$28 sps:$4 sm:$0xff]  }
  0x65   : > { %385 = vmatprep.subr.bf16.mxu0 %v1771_v18  ;;  %1176 = vmatpush1.bf16.msra.mxu1 %v1807_v27  ;;  %v1836_v62 = vld [vmem:[#allocation5 + $0x204] ss:$28 sps:$4 sm:$0xff]   ;;  %v1848_v2 = vld [vmem:[#allocation5 + $0x274] ss:$28 sps:$4 sm:$0xff]   ;;  %v1854_v4 = vld [vmem:[#allocation5 + $0x2ac] ss:$28 sps:$4 sm:$0xff]  }
  0x66   : > { %1177 = vmatprep.subr.bf16.mxu1 %v1808_v28  ;;  %v1846_v3 = vld [vmem:[#allocation5 + $0x270] ss:$28 sps:$4 sm:$0xff]   ;;  %v1852_v5 = vld [vmem:[#allocation5 + $0x2a8] ss:$28 sps:$4 sm:$0xff]   ;;  %v1856_v6 = vld [vmem:[#allocation5 + $0x2dc] ss:$28 sps:$4 sm:$0xff]  }
  0x67   : > { %v1860_v7 = vld [vmem:[#allocation5 + $0x2e4] ss:$28 sps:$4 sm:$0xff]   ;;  %v1861_v9 = vld [vmem:[#allocation5 + $0x2d8] ss:$28 sps:$4 sm:$0xff]   ;;  %v1867_v13 = vld [vmem:[#allocation5 + $0x310] ss:$28 sps:$4 sm:$0xff]  }
  0x68   : > { %386 = vmatpush1.bf16.msra.mxu0 %v1773_v21  ;;  %v1858_v8 = vld [vmem:[#allocation5 + $0x2e0] ss:$28 sps:$4 sm:$0xff]   ;;  %v1862_v10 = vld [vmem:[#allocation5 + $0x314] ss:$28 sps:$4 sm:$0xff]   ;;  %v1868_v14 = vld [vmem:[#allocation5 + $0x34c] ss:$28 sps:$4 sm:$0xff]  }
  0x69   : > { %387 = vmatprep.subr.bf16.mxu0 %v1774_v22  ;;  %1178 = vmatpush1.bf16.msra.mxu1 %v1813_v32  ;;  %v1866_v11 = vld [vmem:[#allocation5 + $0x31c] ss:$28 sps:$4 sm:$0xff]   ;;  %v1872_v15 = vld [vmem:[#allocation5 + $0x354] ss:$28 sps:$4 sm:$0xff]   ;;  %v1873_v17 = vld [vmem:[#allocation5 + $0x348] ss:$28 sps:$4 sm:$0xff]  }
  0x6a   : > { %1179 = vmatprep.subr.bf16.mxu1 %v1814_v33  ;;  %v1864_v12 = vld [vmem:[#allocation5 + $0x318] ss:$28 sps:$4 sm:$0xff]   ;;  %v1870_v16 = vld [vmem:[#allocation5 + $0x350] ss:$28 sps:$4 sm:$0xff]   ;;  %v2261_v21 = vshrl.u32 %v277_v20, 7  ;;  %s1418_s25 = sshll.u32 %s2296_s7, 4  ;;  %s2312_s25 = int_to_ptr.vmem [resolvable:$true] %s1418_s25 }
  0x6b   : > { %v1876_v18 = vld [vmem:[#allocation5 + $0x14] ss:$28 sps:$4 sm:$0xff]   ;;  %v275_v23 = vld [vmem:[%s2366_s2] sm:$0x3]  ;;  %s2323_s22 = scalar_lea.sflag [#allocation4], %s246_s16  ;;  %s2022_s30 = scalar_lea.vmem %s2312_s25, 896 }
  0x6c   : > { %388 = vmatpush1.bf16.msra.mxu0 %v1776_v25  ;;  %v1877_v19 = vld [vmem:[#allocation5 + $0x1d8] ss:$28 sps:$4 sm:$0xff]   ;;  %v279_v22 = vsub.s32 0, %v2261_v21  ;;  %v283_v24 = vsub.s32 1, %v2261_v21  ;;  %v1926_v20 = vld [vmem:[#allocation5 + $0x2b0] ss:$28 sps:$4 sm:$0xff]   ;;  %p2023_p10 = scmp.ne.s32.totalorder %s2312_s25, %s2022_s30 }
  0x6d   : > { %1210 = vmatprep.subr.bf16.mxu0 %v1782_v26  ;;  %1180 = vmatpush1.bf16.msra.mxu1 %v1819_v36  ;;  %p2382_p1 = scmp.ne.s32.totalorder %s2373_s28, 0  ;;  %s2101_s10 = smov [#allocation7]  }
  0x6e   : > { %1181 = vmatprep.subr.bf16.mxu1 %v1820_v37  ;;  %v280_v25 = vrot.slane %v275_v23, %v279_v22  ;;  %v284_v26 = vrot.slane %v275_v23, %v283_v24  ;;  %v1931_v23 = vld [vmem:[#allocation5 + $0x2ec] ss:$28 sps:$4 sm:$0xff]   ;;  %s2026_s9 = sshll.u32 %s2101_s10, 4  ;;  %s2027_s9 = int_to_ptr.vmem [resolvable:$false] %s2026_s9 }
  0x6f   : > { %406 = vmatmul.mubr.bf16.vlgmr.msra.gmra.mrb[0].mxu0 %v1777_v29  ;;  %p2024_p2 = pnand %p2023_p10, %p2382_p1  ;;  %s2028_s11 = scalar_lea.vmem %s2027_s9, 1792 }
  0x70   : > { %1211 = vmatpush1.bf16.msra.mxu0 %v1780_v30  ;;  %p2029_p4 = scmp.lt.s32.totalorder %s2312_s25, %s2027_s9  ;;  %p2030_p7 = scmp.lt.s32.totalorder %s2028_s11, %s2022_s30 }
  0x71   : > { %1212 = vmatprep.subr.bf16.mxu0 %v1788_v31  ;;  %1182 = vmatpush1.bf16.msra.mxu1 %v1825_v40  ;;  %p2025_p3 = pneg %p2024_p2 }
  0x72   : > { %1183 = vmatprep.subr.bf16.mxu1 %v1826_v41  ;;  %p2031_p8 = por %p2030_p7, %p2029_p4 }
  0x74   : > { %1213 = vmatpush1.bf16.msra.mxu0 %v1786_v34  ;;  %p2032_p11 = pnand %p2031_p8, %p2025_p3 }
  0x75   : > { %1214 = vmatprep.subr.bf16.mxu0 %v1794_v35  ;;  %1184 = vmatpush1.bf16.msra.mxu1 %v1831_v44 }
  0x76   : > { %1185 = vmatprep.subr.bf16.mxu1 %v1832_v46  ;;  %v1878_v46 = vld [vmem:[#allocation5 + $0x18] ss:$28 sps:$4 sm:$0xff]  }
  0x78   : > { %1215 = vmatpush1.bf16.msra.mxu0 %v1792_v38 }
  0x79   : > { %1216 = vmatprep.subr.bf16.mxu0 %v1800_v39  ;;  %1186 = vmatpush1.bf16.msra.mxu1 %v1837_v48  ;;  %v1882_v48 = vld [vmem:[#allocation5 + $0x210] ss:$28 sps:$4 sm:$0xff]  }
  0x7a   : > { %1187 = vmatprep.subr.bf16.mxu1 %v1838_v49  ;;  %v1879_v49 = vld [vmem:[#allocation5 + $0x48] ss:$28 sps:$4 sm:$0xff]  }
  0x7c   : > { %1217 = vmatpush1.bf16.msra.mxu0 %v1798_v42 }
  0x7d   : > { %1218 = vmatprep.subr.bf16.mxu0 %v1806_v43  ;;  %1188 = vmatpush1.bf16.msra.mxu1 %v1843_v52  ;;  %v1887_v52 = vld [vmem:[#allocation5 + $0x248] ss:$28 sps:$4 sm:$0xff]  }
  0x7e   : > { %1189 = vmatprep.subr.bf16.mxu1 %v1844_v53  ;;  %v1884_v53 = vld [vmem:[#allocation5 + $0x80] ss:$28 sps:$4 sm:$0xff]  }
  0x80   : > { %1219 = vmatpush1.bf16.msra.mxu0 %v1804_v45  ;;  %v1874_v45 = vld [vmem:[#allocation5 + $0x10] ss:$28 sps:$4 sm:$0xff]  }
  0x81   : > { %1220 = vmatprep.subr.bf16.mxu0 %v1812_v47  ;;  %1190 = vmatpush1.bf16.msra.mxu1 %v1849_v56  ;;  %v1881_v47 = vld [vmem:[#allocation5 + $0x4c] ss:$28 sps:$4 sm:$0xff]   ;;  %v1892_v56 = vld [vmem:[#allocation5 + $0x280] ss:$28 sps:$4 sm:$0xff]  }
  0x82   : > { %1191 = vmatprep.subr.bf16.mxu1 %v1850_v57  ;;  %v1889_v57 = vld [vmem:[#allocation5 + $0xb8] ss:$28 sps:$4 sm:$0xff]  }
  0x84   : > { %1221 = vmatpush1.bf16.msra.mxu0 %v1810_v50  ;;  %v1883_v50 = vld [vmem:[#allocation5 + $0x50] ss:$28 sps:$4 sm:$0xff]  }
  0x85   : > { %1222 = vmatprep.subr.bf16.mxu0 %v1818_v51  ;;  %1192 = vmatpush1.bf16.msra.mxu1 %v1855_v60  ;;  %v1886_v51 = vld [vmem:[#allocation5 + $0x84] ss:$28 sps:$4 sm:$0xff]   ;;  %v1897_v60 = vld [vmem:[#allocation5 + $0x2b8] ss:$28 sps:$4 sm:$0xff]  }
  0x86   : > { %1193 = vmatprep.subr.bf16.mxu1 %v1856_v6  ;;  %v1908_v6 = vld [vmem:[#allocation5 + $0x168] ss:$28 sps:$4 sm:$0xff]  }
  0x88   : > { %1223 = vmatpush1.bf16.msra.mxu0 %v1816_v54  ;;  %v1888_v54 = vld [vmem:[#allocation5 + $0x88] ss:$28 sps:$4 sm:$0xff]  }
  0x89   : > { %1224 = vmatprep.subr.bf16.mxu0 %v1824_v55  ;;  %1194 = vmatpush1.bf16.msra.mxu1 %v1861_v9  ;;  %v1891_v55 = vld [vmem:[#allocation5 + $0xbc] ss:$28 sps:$4 sm:$0xff]  }
  0x8a   : > { %1195 = vmatprep.subr.bf16.mxu1 %v1862_v10  ;;  %v1909_v9 = vld [vmem:[#allocation5 + $0x198] ss:$28 sps:$4 sm:$0xff]   ;;  %v1913_v10 = vld [vmem:[#allocation5 + $0x1a0] ss:$28 sps:$4 sm:$0xff]  }
  0x8c   : > { %1225 = vmatpush1.bf16.msra.mxu0 %v1822_v58  ;;  %v1893_v58 = vld [vmem:[#allocation5 + $0xc0] ss:$28 sps:$4 sm:$0xff]  }
  0x8d   : > { %1226 = vmatprep.subr.bf16.mxu0 %v1830_v59  ;;  %1196 = vmatpush1.bf16.msra.mxu1 %v1867_v13  ;;  %v1896_v59 = vld [vmem:[#allocation5 + $0xf4] ss:$28 sps:$4 sm:$0xff]   ;;  %v1919_v13 = vld [vmem:[#allocation5 + $0x20c] ss:$28 sps:$4 sm:$0xff]  }
  0x8e   : > { %1197 = vmatprep.subr.bf16.mxu1 %v1868_v14  ;;  %v1917_v14 = vld [vmem:[#allocation5 + $0x208] ss:$28 sps:$4 sm:$0xff]  }
  0x90   : > { %1227 = vmatpush1.bf16.msra.mxu0 %v1828_v61  ;;  %v1894_v61 = vld [vmem:[#allocation5 + $0xf0] ss:$28 sps:$4 sm:$0xff]  }
  0x91   : > { %1228 = vmatprep.subr.bf16.mxu0 %v1836_v62  ;;  %1198 = vmatpush1.bf16.msra.mxu1 %v1873_v17  ;;  %v1898_v62 = vld [vmem:[#allocation5 + $0xf8] ss:$28 sps:$4 sm:$0xff]  }
  0x92   : > { %1253 = vmatprep.subr.bf16.mxu1 %v1876_v18  ;;  %v1925_v17 = vld [vmem:[#allocation5 + $0x27c] ss:$28 sps:$4 sm:$0xff]  }
  0x93   : > { %v1923_v18 = vld [vmem:[#allocation5 + $0x278] ss:$28 sps:$4 sm:$0xff]  }
  0x94   : > { %1229 = vmatpush1.bf16.msra.mxu0 %v1834_v63  ;;  %v1901_v63 = vld [vmem:[#allocation5 + $0x12c] ss:$28 sps:$4 sm:$0xff]  }
  0x95   : > { %1230 = vmatprep.subr.bf16.mxu0 %v1842_v0  ;;  %v1902_v0 = vld [vmem:[#allocation5 + $0x2f0] ss:$28 sps:$4 sm:$0xff]  }
  0x98   : > { %1231 = vmatpush1.bf16.msra.mxu0 %v1840_v1  ;;  %v1899_v1 = vld [vmem:[#allocation5 + $0x128] ss:$28 sps:$4 sm:$0xff]  }
  0x99   : > { %1232 = vmatprep.subr.bf16.mxu0 %v1848_v2  ;;  %v1903_v2 = vld [vmem:[#allocation5 + $0x130] ss:$28 sps:$4 sm:$0xff]  }
  0x9c   : > { %1233 = vmatpush1.bf16.msra.mxu0 %v1846_v3  ;;  %v1906_v3 = vld [vmem:[#allocation5 + $0x164] ss:$28 sps:$4 sm:$0xff]  }
  0x9d   : > { %1234 = vmatprep.subr.bf16.mxu0 %v1854_v4  ;;  %v1907_v4 = vld [vmem:[#allocation5 + $0x328] ss:$28 sps:$4 sm:$0xff]  }
  0xa0   : > { %1235 = vmatpush1.bf16.msra.mxu0 %v1852_v5  ;;  %v1904_v5 = vld [vmem:[#allocation5 + $0x160] ss:$28 sps:$4 sm:$0xff]  }
  0xa1   : > { %1236 = vmatprep.subr.bf16.mxu0 %v1860_v7  ;;  %v1911_v7 = vld [vmem:[#allocation5 + $0x19c] ss:$28 sps:$4 sm:$0xff]  }
  0xa4   : > { %1237 = vmatpush1.bf16.msra.mxu0 %v1858_v8  ;;  %v1912_v8 = vld [vmem:[#allocation5 + $0x360] ss:$28 sps:$4 sm:$0xff]  }
  0xa5   : > { %1238 = vmatprep.subr.bf16.mxu0 %v1866_v11  ;;  %v1916_v11 = vld [vmem:[#allocation5 + $0x1d4] ss:$28 sps:$4 sm:$0xff]  }
  0xa8   : > { %1239 = vmatpush1.bf16.msra.mxu0 %v1864_v12  ;;  %v1914_v12 = vld [vmem:[#allocation5 + $0x1d0] ss:$28 sps:$4 sm:$0xff]  }
  0xa9   : > { %1240 = vmatprep.subr.bf16.mxu0 %v1872_v15  ;;  %v1922_v15 = vld [vmem:[#allocation5 + $0x244] ss:$28 sps:$4 sm:$0xff]  }
  0xac   : > { %1241 = vmatpush1.bf16.msra.mxu0 %v1870_v16  ;;  %v1920_v16 = vld [vmem:[#allocation5 + $0x240] ss:$28 sps:$4 sm:$0xff]  }
  0xad   : > { %1662 = vmatprep.subr.bf16.mxu0 %v1877_v19  ;;  %v1928_v19 = vld [vmem:[#allocation5 + $0x2b4] ss:$28 sps:$4 sm:$0xff]  }
 0x142   : > { %v407_v27 = vpop.f32.mrb[0].mxu0 }
 0x143   : > { %v408_v28 = vadd.f32 %v407_v27, %v280_v25  ;;  %v409_v29 = vpop.f32.mrb[1].mxu0  ;;  %v1932_v27 = vld [vmem:[#allocation5 + $0x320] ss:$28 sps:$4 sm:$0xff]  }
 0x144   : > { %v410_v30 = vadd.f32 %v409_v29, %v284_v26  ;;  %v411_v31 = vpop.f32.mrb[2].mxu0  ;;  %v1935_v29 = vld [vmem:[#allocation5 + $0x358] ss:$28 sps:$4 sm:$0xff]  }
 0x145   : > { %v416_v32 = vmul.f32 0.01, %v408_v28  ;;  %v412_v33 = vadd.f32 %v411_v31, %v280_v25  ;;  %v413_v34 = vpop.f32.mrb[3].mxu0  ;;  %v1929_v25 = vld [vmem:[#allocation5 + $0x2e8] ss:$28 sps:$4 sm:$0xff]  }
 0x146   : > { %v417_v35 = vmul.f32 0.01, %v410_v30  ;;  %v414_v36 = vadd.f32 %v413_v34, %v284_v26  ;;  %v1934_v26 = vld [vmem:[#allocation5 + $0x324] ss:$28 sps:$4 sm:$0xff]  }
 0x147   : > { %v418_v37 = vmul.f32 0.01, %v412_v33  ;;  %v420_v39 = vmax.f32 %v408_v28, %v416_v32  ;;  %v1937_v28 = vld [vmem:[#allocation5 + $0x35c] ss:$28 sps:$4 sm:$0xff]   ;;  %v2282_v31 = vld [vmem:[%s2368_s4] sm:$0xff]  ;;  %v570_v32 = vsub.s32 3, %v2261_v21 }
 0x148   : > { %v419_v38 = vmul.f32 0.01, %v414_v36  ;;  %v421_v41 = vmax.f32 %v410_v30, %v417_v35  ;;  %v566_v30 = vsub.s32 2, %v2261_v21  ;;  %v563_v35 = vrot.slane %v2282_v31, %v283_v24 }
 0x149   : > { %v422_v40 = vmax.f32 %v412_v33, %v418_v37  ;;  %v559_v33 = vrot.slane %v2282_v31, %v279_v22 }
 0x14a   : > { %v423_v42 = vmax.f32 %v414_v36, %v419_v38  ;;  %v567_v34 = vrot.slane %v2282_v31, %v566_v30  ;;  %v571_v36 = vrot.slane %v2282_v31, %v570_v32 }
 0x14b   : > { %v2272_v43 = vpack.c.bf16 %v422_v40, %v420_v39 }
 0x14c   : > { %v425_v44 = vpack.c.bf16 %v423_v42, %v421_v41 }
 0x14e   : > { %1199 = vmatprep.mubr.bf16.mxu1 %v425_v44  ;;  %1242 = vmatprep.mubr.bf16.mxu0 %v425_v44 }
 0x14f   : > { %1200 = vmatmul.mubr.bf16.vlgmr.msra.gmra.mrb[0].mxu1 %v2272_v43  ;;  %1243 = vmatmul.mubr.bf16.vlgmr.msra.gmra.mrb[4].mxu0 %v2272_v43 }
 0x150   : > { %1254 = vmatpush1.bf16.msra.mxu1 %v1874_v45  ;;  %1663 = vmatpush3.bf16.msra.mxu0 %v1878_v46 }
 0x151   : > { %1285 = vmatprep.mubr.bf16.mxu1 %v425_v44  ;;  %1328 = vmatprep.mubr.bf16.mxu0 %v425_v44 }
 0x152   : > { %1255 = vmatprep.subr.bf16.mxu1 %v1881_v47  ;;  %1664 = vmatprep.subr.bf16.mxu0 %v1882_v48 }
 0x154   : > { %1256 = vmatpush1.bf16.msra.mxu1 %v1879_v49  ;;  %1665 = vmatpush3.bf16.msra.mxu0 %v1883_v50 }
 0x155   : > { %1257 = vmatprep.subr.bf16.mxu1 %v1886_v51  ;;  %1666 = vmatprep.subr.bf16.mxu0 %v1887_v52 }
 0x158   : > { %1258 = vmatpush1.bf16.msra.mxu1 %v1884_v53  ;;  %1667 = vmatpush3.bf16.msra.mxu0 %v1888_v54 }
 0x159   : > { %1259 = vmatprep.subr.bf16.mxu1 %v1891_v55  ;;  %1668 = vmatprep.subr.bf16.mxu0 %v1892_v56 }
 0x15c   : > { %1260 = vmatpush1.bf16.msra.mxu1 %v1889_v57  ;;  %1669 = vmatpush3.bf16.msra.mxu0 %v1893_v58 }
 0x15d   : > { %1261 = vmatprep.subr.bf16.mxu1 %v1896_v59  ;;  %1670 = vmatprep.subr.bf16.mxu0 %v1897_v60 }
 0x160   : > { %1262 = vmatpush1.bf16.msra.mxu1 %v1894_v61  ;;  %1671 = vmatpush3.bf16.msra.mxu0 %v1898_v62 }
 0x161   : > { %1263 = vmatprep.subr.bf16.mxu1 %v1901_v63  ;;  %1672 = vmatprep.subr.bf16.mxu0 %v1902_v0  ;;  %v582_v63 = vsub.s32 6, %v2261_v21 }
 0x164   : > { %1264 = vmatpush1.bf16.msra.mxu1 %v1899_v1  ;;  %1673 = vmatpush3.bf16.msra.mxu0 %v1903_v2  ;;  %v583_v1 = vrot.slane %v2282_v31, %v582_v63 }
 0x165   : > { %1265 = vmatprep.subr.bf16.mxu1 %v1906_v3  ;;  %1674 = vmatprep.subr.bf16.mxu0 %v1907_v4 }
 0x168   : > { %1266 = vmatpush1.bf16.msra.mxu1 %v1904_v5  ;;  %1675 = vmatpush3.bf16.msra.mxu0 %v1908_v6 }
 0x169   : > { %1267 = vmatprep.subr.bf16.mxu1 %v1911_v7  ;;  %1676 = vmatprep.subr.bf16.mxu0 %v1912_v8 }
 0x16c   : > { %1268 = vmatpush1.bf16.msra.mxu1 %v1909_v9  ;;  %1677 = vmatpush3.bf16.msra.mxu0 %v1913_v10 }
 0x16d   : > { %1269 = vmatprep.subr.bf16.mxu1 %v1916_v11 }
 0x16f   : > { %1329 = vmatmul.mubr.bf16.vlgmr.msra.gmra.mrb[8].mxu0 %v2272_v43 }
 0x170   : > { %1270 = vmatpush1.bf16.msra.mxu1 %v1914_v12 }
 0x171   : > { %1271 = vmatprep.subr.bf16.mxu1 %v1919_v13  ;;  %v574_v13 = vsub.s32 4, %v2261_v21 }
 0x174   : > { %1272 = vmatpush1.bf16.msra.mxu1 %v1917_v14  ;;  %v578_v14 = vsub.s32 5, %v2261_v21 }
 0x175   : > { %1273 = vmatprep.subr.bf16.mxu1 %v1922_v15  ;;  %v575_v15 = vrot.slane %v2282_v31, %v574_v13 }
 0x178   : > { %1274 = vmatpush1.bf16.msra.mxu1 %v1920_v16  ;;  %v579_v16 = vrot.slane %v2282_v31, %v578_v14 }
 0x179   : > { %1275 = vmatprep.subr.bf16.mxu1 %v1925_v17 }
 0x17c   : > { %1276 = vmatpush1.bf16.msra.mxu1 %v1923_v18 }
 0x17d   : > { %1277 = vmatprep.subr.bf16.mxu1 %v1928_v19 }
 0x180   : > { %1278 = vmatpush1.bf16.msra.mxu1 %v1926_v20 }
 0x181   : > { %1279 = vmatprep.subr.bf16.mxu1 %v1931_v23 }
 0x184   : > { %1280 = vmatpush1.bf16.msra.mxu1 %v1929_v25 }
 0x185   : > { %1281 = vmatprep.subr.bf16.mxu1 %v1934_v26 }
 0x188   : > { %1282 = vmatpush1.bf16.msra.mxu1 %v1932_v27 }
 0x189   : > { %1283 = vmatprep.subr.bf16.mxu1 %v1937_v28 }
 0x18c   : > { %1284 = vmatpush1.bf16.msra.mxu1 %v1935_v29 }
 0x18f   : > { %1286 = vmatmul.mubr.bf16.vlgmr.msra.gmra.mrb[4].mxu1 %v2272_v43 }
 0x222   : > { %v1201_v37 = vpop.f32.mrb[0].mxu1  ;;  %v1244_v38 = vpop.f32.mrb[4].mxu0 }
 0x223   : > { %v1202_v39 = vadd.f32 %v1201_v37, %v559_v33  ;;  %v1245_v40 = vadd.f32 %v1244_v38, %v567_v34  ;;  %v1203_v41 = vpop.f32.mrb[1].mxu1  ;;  %v1246_v42 = vpop.f32.mrb[5].mxu0 }
 0x224   : > { %v1204_v43 = vadd.f32 %v1203_v41, %v563_v35  ;;  %v1247_v44 = vadd.f32 %v1246_v42, %v571_v36  ;;  %v1205_v45 = vpop.f32.mrb[2].mxu1  ;;  %v1248_v46 = vpop.f32.mrb[6].mxu0 }
 0x225   : > { %1938 = vtanh.f32 %v1202_v39  ;;  %v1206_v22 = vadd.f32 %v1205_v45, %v559_v33  ;;  %v1207_v47 = vpop.f32.mrb[3].mxu1  ;;  %v1250_v48 = vpop.f32.mrb[7].mxu0  ;;  %v1249_v24 = vadd.f32 %v1248_v46, %v567_v34 }
 0x226   : > { %1940 = vtanh.f32 %v1245_v40  ;;  %v1208_v49 = vadd.f32 %v1207_v47, %v563_v35  ;;  %v1251_v50 = vadd.f32 %v1250_v48, %v571_v36 }
 0x227   : > { %1942 = vtanh.f32 %v1204_v43 }
 0x228   : > { %1944 = vtanh.f32 %v1247_v44 }
 0x229   : > { %1946 = vtanh.f32 %v1206_v22 }
 0x22a   : > { %1948 = vtanh.f32 %v1249_v24 }
 0x22b   : > { %1950 = vtanh.f32 %v1208_v49 }
 0x22c   : > { %1952 = vtanh.f32 %v1251_v50 }
 0x22f   : > { %v1939_v51 = vpop.eup %1938 }
 0x230   : > { %v1941_v52 = vpop.eup %1940 }
 0x231   : > { %v1943_v53 = vpop.eup %1942 }
 0x232   : > { %v1945_v54 = vpop.eup %1944  ;;  %v1654_v55 = vpack.c.bf16 %v1943_v53, %v1939_v51 }
 0x233   : > { %v1947_v56 = vpop.eup %1946  ;;  %v1655_v57 = vpack.c.bf16 %v1945_v54, %v1941_v52 }
 0x234   : > { %v1949_v58 = vpop.eup %1948  ;;  %1395 = vst [vmem:[%s2296_s7] sm:$0xff] %v1654_v55 }
 0x235   : > { %v1951_v59 = vpop.eup %1950  ;;  %1396 = vst [vmem:[%s2296_s7 + $0x8] sm:$0xff] %v1655_v57 }
 0x236   : > { %v1953_v60 = vpop.eup %1952  ;;  %v1658_v61 = vpack.c.bf16 %v1951_v59, %v1947_v56 }
 0x237   : > { %v1659_v62 = vpack.c.bf16 %v1953_v60, %v1949_v58 }
 0x238   : > { %1399 = vst [vmem:[%s2296_s7 + $0x1c] sm:$0xff] %v1658_v61 }
 0x239   : > { %1400 = vst [vmem:[%s2296_s7 + $0x24] sm:$0xff] %v1659_v62 }
 0x242   : > { %v1678_v0 = vpop.f32.mrb[8].mxu0 }
 0x243   : > { %v1679_v2 = vpop.f32.mrb[9].mxu0 }
 0x244   : > { %v1680_v3 = vadd.f32 %v1679_v2, %v1678_v0  ;;  %v1681_v4 = vpop.f32.mrb[10].mxu0 }
 0x245   : > { %v1682_v5 = vpop.f32.mrb[11].mxu0 }
 0x246   : > { %v1331_v6 = vadd.f32 %v1680_v3, %v583_v1  ;;  %v1683_v7 = vadd.f32 %v1682_v5, %v1681_v4 }
 0x248   : > { %1954 = vtanh.f32 %v1331_v6  ;;  %v1334_v8 = vadd.f32 %v1683_v7, %v583_v1 }
 0x24a   : > { %1956 = vtanh.f32 %v1334_v8 }
 0x252   : > { %v1955_v9 = vpop.eup %1954 }
 0x253   : > { %v1657_v10 = vpack.c.bf16 %v1955_v9, %v1955_v9 }
 0x254   : > { %v1957_v11 = vpop.eup %1956 }
 0x255   : > { %1398 = vst [vmem:[%s2296_s7 + $0x18] sm:$0xf] %v1657_v10  ;;  %v1661_v12 = vpack.c.bf16 %v1957_v11, %v1957_v11 }
 0x257   : > { %1402 = vst [vmem:[%s2296_s7 + $0x34] sm:$0xf] %v1661_v12 }
 0x262   : > { %v1287_v17 = vpop.f32.mrb[4].mxu1 }
 0x263   : > { %v1288_v18 = vadd.f32 %v1287_v17, %v575_v15  ;;  %v1289_v19 = vpop.f32.mrb[5].mxu1 }
 0x264   : > { %v1290_v20 = vadd.f32 %v1289_v19, %v579_v16  ;;  %v1291_v23 = vpop.f32.mrb[6].mxu1 }
 0x265   : > { %1958 = vtanh.f32 %v1288_v18  ;;  %v1292_v25 = vadd.f32 %v1291_v23, %v575_v15  ;;  %v1293_v26 = vpop.f32.mrb[7].mxu1 }
 0x266   : > { %1960 = vtanh.f32 %v1290_v20  ;;  %v1294_v27 = vadd.f32 %v1293_v26, %v579_v16 }
 0x267   : > { %1962 = vtanh.f32 %v1292_v25 }
 0x268   : > { %1964 = vtanh.f32 %v1294_v27 }
 0x26f   : > { %v1959_v21 = vpop.eup %1958 }
 0x270   : > { %v1961_v28 = vpop.eup %1960 }
 0x271   : > { %v1963_v29 = vpop.eup %1962  ;;  %v1656_v30 = vpack.c.bf16 %v1961_v28, %v1959_v21 }
 0x272   : > { %v1965_v31 = vpop.eup %1964 }
 0x273   : > { %1397 = vst [vmem:[%s2296_s7 + $0x10] sm:$0xff] %v1656_v30  ;;  %v1660_v32 = vpack.c.bf16 %v1965_v31, %v1963_v29 }
 0x275   : > { %1401 = vst [vmem:[%s2296_s7 + $0x2c] sm:$0xff] %v1660_v32 }
 0x276   : > { %2035 = shalt.err (!%p2032_p11)
}
 0x277   : > { %s2036_s12 = scalar_lea.hbm %s2318_s8, 896  ;;  %s2040_s15 = scalar_lea.hbm %s2369_s5, 1792 }
 0x278   : > { %p2037_p13 = scmp.ne.s32.totalorder %s2318_s8, %s2036_s12  ;;  %p2041_p6 = scmp.lt.u32.totalorder %s2318_s8, %s2369_s5 }
 0x279   : > { %p2042_p9 = scmp.lt.u32.totalorder %s2040_s15, %s2036_s12  ;;  %p2044_p10 = scmp.lt.u32.totalorder %s2036_s12, %s2318_s8 }
 0x27a   : > { %p2038_p0 = pnand %p2037_p13, %p2382_p1 }
 0x27b   : > { %p2043_p12 = por %p2042_p9, %p2041_p6 }
 0x27c   : > { %p2039_p5 = pneg %p2038_p0 }
 0x27d   : > { %p2045_p2 = por %p2044_p10, %p2043_p12 }
 0x27f   : > { %p2046_p3 = pnand %p2045_p2, %p2039_p5 }
 0x281   : > { %2049 = shalt.err (!%p2046_p3)
}
 0x282   : > { %s2102_s7 = smov 448   ;;  %s2103_s23 = smov 28  }
 0x283   : > { %1694 = dma.vmem_to_hbm [thread:$0]  (%p2382_p1), %s2312_s25, 896, %s2318_s8, %s2323_s22, %s2102_s7, %s2102_s7, %s2103_s23  }
 0x284 PF: > { %p1711_p4 = scmp.ge.s32.totalorder %s2092_s21, 2  ;;  %s1433_s26 = sand.u32 1, %s2080_s18  }
 0x285   : > { %p2383_p7 = scmp.ne.s32.totalorder %s2374_s29, 0  ;;  %s1434_s6 = scalar_lea.sflag [#allocation4], %s1433_s26 }
 0x287   : > { %p1704_p8 = pnand %p1711_p4, %p2383_p7 }
 0x289   : > { %2075 = dma.done.wait (!%p1704_p8), %s1434_s6, 896  }
 0x28a   : > { %2077 = vsyncadd (!%p1704_p8), %s1434_s6, 4294966400  ;;  %p17_p11 = scmp.ge.s32.totalorder %s2159_s24, 4   ;;  %s2384_s18 = smov %s2084_s19 }
 0x28b   : > { %s2385_s19 = smov %s2088_s20  ;;  %s2386_s20 = smov %s2170_s27 }
 0x28c   : > { %s2387_s21 = smov %s2159_s24  ;;  %19 = sbr.rel (!%p17_p11) target bundleno = 5 (0x5), region = 84 }
 0x293   :  { %1439 = vsyncpa [#allocation3], 1 }
 0x294   :  { %1441 = vsyncpa [#allocation3 + $0x1], 1 }
 0x295   :  { %1442 = vsyncpa [#allocation6], 1 }
 0x296   :  { %1443 = vsyncpa [#allocation4], 1 }
 0x297   :  { %1445 = vsyncpa [#allocation4 + $0x1], 1 }

</bundles_post_ra>
